<compile_context>
chip_gen: v5e
topology: v5e:2x2
jax: 0.10.0
libtpu: 0.0.40
codegen_flags: <defaults>
</compile_context>

<pallas_src>
import math

import jax
import jax.numpy as jnp
from jax import lax
from jax.experimental import pallas as pl
from jax.experimental.pallas import tpu as pltpu

SAFE_V = 0.999999
EPS = 1e-8

# Abramowitz & Stegun 4.4.46: acos(x) = sqrt(1-x) * poly(x) on [0, 1], |err| <= 2e-8 rad.
_ACOS_COEFFS = (1.5707963050, -0.2145988016, 0.0889789874, -0.0501743046,
                0.0308918810, -0.0170881256, 0.0066700901, -0.0012624911)


def _round_up(x, m):
    return ((x + m - 1) // m) * m


def _vmem_capacity_bytes():
    try:
        return int(pltpu.get_tpu_info().vmem_capacity_bytes)
    except Exception:
        return 64 << 20  # conservative default (v7x per-core physical VMEM)


def _make_loss_kernel(N, C, TL, HW, FW, needs_mask):
    nfold = max(1, TL // FW)

    def lane_fold(x):
        # Fold the last (lane) axis from TL down to FW with 128-aligned VALU adds only
        # (no cross-lane XLU reduction; the tiny host-side jnp.sum finishes the job).
        acc = x[..., 0:FW]
        for c in range(1, nfold):
            acc = acc + x[..., c * FW:(c + 1) * FW]
        return acc

    def kernel(p_ref, t_ref, l1_ref, ce_ref, ang_ref):
        # (N, C, TL) blocks in the input dtype; upcast to f32 inside VMEM.
        p = p_ref[...].astype(jnp.float32)
        t = t_ref[...].astype(jnp.float32)

        if needs_mask:
            start = pl.program_id(0) * TL
            lane = lax.broadcasted_iota(jnp.int32, (1, TL), 1) + start
            valid2 = lane < HW            # (1, TL)
            valid3 = valid2[:, None, :]   # (1, 1, TL)

        # ---- L1 partial: |p - t| folded over lanes (pure VALU) ----
        absd = jnp.abs(p - t)                                   # (N, C, TL)
        if needs_mask:
            absd = jnp.where(valid3, absd, 0.0)

        # ---- Cross entropy (probability targets), reduced over the C (sublane) axis ----
        #   -sum_c t * log_softmax(p) = lse * sum_c t - sum_c t * (p - max)
        mx = jnp.max(p, axis=1, keepdims=True)                  # (N, 1, TL)
        pm = p - mx                                             # (N, C, TL)
        lse = jnp.log(jnp.sum(jnp.exp(pm), axis=1))             # (N, TL)
        ce_rows = lse * jnp.sum(t, axis=1) - jnp.sum(t * pm, axis=1)   # (N, TL)

        # ---- Angular loss: clamped cosine -> acos (poly + EUP sqrt) -> degrees ----
        dot = jnp.sum(p * t, axis=1)                            # (N, TL)
        sp = jnp.sum(p * p, axis=1)
        st = jnp.sum(t * t, axis=1)
        # max(||x||, eps) == sqrt(max(||x||^2, eps^2)); rsqrt keeps the divide on the EUP.
        inv_norm = lax.rsqrt(jnp.maximum(sp, EPS * EPS)) * lax.rsqrt(jnp.maximum(st, EPS * EPS))
        cos = jnp.clip(dot * inv_norm, -SAFE_V, SAFE_V)         # (N, TL)
        xa = jnp.abs(cos)
        poly = jnp.float32(_ACOS_COEFFS[7])
        for coeff in _ACOS_COEFFS[6::-1]:
            poly = poly * xa + jnp.float32(coeff)
        acos_pos = poly * jnp.sqrt(jnp.maximum(1.0 - xa, 0.0))
        acos_v = jnp.where(cos >= 0.0, acos_pos, jnp.float32(math.pi) - acos_pos)
        ang_rows = acos_v * jnp.float32(180.0 / math.pi)        # (N, TL)

        if needs_mask:
            ce_rows = jnp.where(valid2, ce_rows, 0.0)
            ang_rows = jnp.where(valid2, ang_rows, 0.0)

        # Lane-resident per-tile partial sums (VALU folds only); host finishes the reduction.
        l1_ref[...] = lane_fold(absd)       # (N, C, FW)
        ce_ref[...] = lane_fold(ce_rows)    # (N, FW)
        ang_ref[...] = lane_fold(ang_rows)  # (N, FW)

    return kernel


@jax.jit
def _fused_losses(y_hat, y):
    N, C, H, W = y_hat.shape
    HW = H * W
    # Free contiguous reshape (no transpose): spatial axis becomes the lane axis.
    p = y_hat.reshape(N, C, HW)
    t = y.reshape(N, C, HW)

    itemsize = jnp.dtype(p.dtype).itemsize
    # Real VMEM footprint of an (N, C, TL) block: C is sublane-padded to 8 (f32) /
    # 16 (bf16) / 32 (int8) rows.
    sub = max(8, 32 // itemsize)
    padC = _round_up(C, sub)

    cap = _vmem_capacity_bytes()
    # Generation-aware scoped-VMEM ceiling: ~30 MiB on v7x (64 MiB physical),
    # ~48 MiB on v5e/v6e (128 MiB physical).
    vmem_ceiling = (30 << 20) if cap <= (64 << 20) else (48 << 20)

    # Per-lane-column bytes: 2 inputs x 2 pipeline buffers of the padded block, plus
    # headroom for the in-kernel f32 temporaries (p, t, pm, exp, products, ...).
    per_lane = 2 * 2 * N * padC * itemsize + 8 * N * 8 * 4
    tl_budget = max(128, ((vmem_ceiling - (4 << 20)) // per_lane) // 128 * 128)

    if HW <= 128:
        TL = HW                                   # block equals full lane extent (allowed)
    else:
        aligned_max = (HW // 128) * 128
        TL = min(tl_budget, aligned_max, 8192)
        if pl.cdiv(HW, TL) == 1:
            # Ensure >= 2 grid steps so both v7x TensorCores get work on the parallel axis
            # (harmless extra step on single-TC v5e/v6e).
            TL = max(128, min(aligned_max, _round_up(-(-HW // 2), 128)))
    nL = pl.cdiv(HW, TL)
    FW = min(TL, 128)
    needs_mask = (HW % TL) != 0                   # ragged last tile -> in-kernel lane mask

    kernel = _make_loss_kernel(N, C, TL, HW, FW, needs_mask)

    in_block_bytes = N * padC * TL * itemsize     # sublane-padded VMEM block size
    vmem_bytes = int(min(vmem_ceiling,
                         max(8 << 20,
                             2 * 2 * in_block_bytes + 8 * N * 8 * TL * 4 + (2 << 20))))

    cost = pl.CostEstimate(
        flops=int(14 * N * C * HW + 30 * N * HW),
        transcendentals=int(N * C * HW + 4 * N * HW),
        bytes_accessed=int(2 * N * C * HW * itemsize
                           + nL * (N * C * FW + 2 * N * FW) * 4),
    )

    l1_parts, ce_parts, ang_parts = pl.pallas_call(
        kernel,
        out_shape=(
            jax.ShapeDtypeStruct((nL, N, C, FW), jnp.float32),   # L1 lane partials
            jax.ShapeDtypeStruct((nL, N, FW), jnp.float32),      # CE lane partials
            jax.ShapeDtypeStruct((nL, N, FW), jnp.float32),      # angle(deg) lane partials
        ),
        grid=(nL,),
        in_specs=[
            pl.BlockSpec((N, C, TL), lambda l: (0, 0, l)),
            pl.BlockSpec((N, C, TL), lambda l: (0, 0, l)),
        ],
        out_specs=(
            pl.BlockSpec((None, N, C, FW), lambda l: (l, 0, 0, 0)),
            pl.BlockSpec((None, N, FW), lambda l: (l, 0, 0)),
            pl.BlockSpec((None, N, FW), lambda l: (l, 0, 0)),
        ),
        compiler_params=pltpu.CompilerParams(
            dimension_semantics=("parallel",),    # no carried state across tiles
            vmem_limit_bytes=vmem_bytes,
        ),
        cost_estimate=cost,
        # TODO(synk): if xprof shows exposed DMA per step, bump in_specs to
        # pipeline_mode=pl.Buffered(3) after re-checking the VMEM budget.
    )(p, t)

    # Tiny final reductions + single divide per loss in plain JAX.
    l1 = jnp.sum(l1_parts) * (1.0 / float(N * C * HW))
    ce = jnp.sum(ce_parts) * (1.0 / float(N * HW))
    ang = jnp.sum(ang_parts) * (1.0 / float(N * HW))
    return l1, ce, ang


class MasterCriterion:
    """JAX/Pallas port of criterions.criterion.MasterCriterion (no learnable parameters)."""

    def __init__(self, cfg):
        self.cfg = cfg
        self.key_pairs = cfg["criterion"]["key_pairs"]

    def __call__(self, pred_dict, gt_dict, phase):
        y_hat = pred_dict["y_hat"]   # (N, C, H, W) like PyTorch NCHW
        y = gt_dict["y"]             # (N, C, H, W) soft/probability targets

        l1, ce, ang = _fused_losses(y_hat, y)
        mod_losses = {"l1_loss": l1, "cross_entropy": ce, "angular_loss": ang}

        loss_dict = {}
        total_loss = jnp.float32(0.0)
        for loss_key in self.key_pairs:
            mod_key = self.cfg["criterion"][loss_key]["mod"]
            alpha = self.cfg["criterion"][loss_key]["alpha"]
            loss = mod_losses[mod_key]
            loss_dict[f"{phase}-{loss_key}"] = loss
            total_loss = total_loss + alpha * loss
        loss_dict[f"{phase}-total_loss"] = total_loss
        return loss_dict


def _reference_losses(y_hat, y):
    """Pure-JAX reference mirroring the PyTorch modules (for a sanity check)."""
    l1 = jnp.mean(jnp.abs(y_hat - y))
    logsm = jax.nn.log_softmax(y_hat, axis=1)
    ce = jnp.mean(jnp.sum(-y * logsm, axis=1))
    dot = jnp.sum(y_hat * y, axis=1)
    n_p = jnp.maximum(jnp.linalg.norm(y_hat, axis=1), EPS)
    n_t = jnp.maximum(jnp.linalg.norm(y, axis=1), EPS)
    cos = jnp.clip(dot / (n_p * n_t), -SAFE_V, SAFE_V)
    ang = jnp.mean(jnp.arccos(cos) * (180.0 / math.pi))
    return l1, ce, ang


def _check(y_hat, y):
    l1, ce, ang = _fused_losses(y_hat, y)
    l1 = jax.block_until_ready(l1)
    l1_r, ce_r, ang_r = _reference_losses(y_hat, y)
    assert jnp.allclose(l1, l1_r, rtol=1e-4, atol=1e-5), (l1, l1_r)
    assert jnp.allclose(ce, ce_r, rtol=1e-4, atol=1e-5), (ce, ce_r)
    assert jnp.allclose(ang, ang_r, rtol=1e-4, atol=1e-3), (ang, ang_r)


if __name__ == "__main__":
    # Synthetic config mimicking cfg.criterion.* from the PyTorch code.
    cfg = {
        "criterion": {
            "key_pairs": ["pixel", "class", "angle"],
            "pixel": {"mod": "l1_loss", "alpha": 1.0},
            "class": {"mod": "cross_entropy", "alpha": 0.5},
            "angle": {"mod": "angular_loss", "alpha": 0.1},
        }
    }

    key = jax.random.PRNGKey(0)

    # Main case: (2, 4, 16, 16) -> HW = 256, two 128-lane tiles (exercises the parallel grid).
    N, C, H, W = 2, 4, 16, 16
    k1, k2 = jax.random.split(key)
    y_hat = jax.random.normal(k1, (N, C, H, W), dtype=jnp.float32)           # logits / prediction
    y = jax.nn.softmax(jax.random.normal(k2, (N, C, H, W)), axis=1).astype(jnp.float32)

    criterion = MasterCriterion(cfg)
    loss_dict = criterion({"y_hat": y_hat}, {"y": y}, phase="train")
    loss_dict = jax.tree_util.tree_map(jax.block_until_ready, loss_dict)

    l1_ref, ce_ref, ang_ref = _reference_losses(y_hat, y)
    assert jnp.allclose(loss_dict["train-pixel"], l1_ref, rtol=1e-4, atol=1e-5)
    assert jnp.allclose(loss_dict["train-class"], ce_ref, rtol=1e-4, atol=1e-5)
    assert jnp.allclose(loss_dict["train-angle"], ang_ref, rtol=1e-4, atol=1e-3)
    total_ref = 1.0 * l1_ref + 0.5 * ce_ref + 0.1 * ang_ref
    assert jnp.allclose(loss_dict["train-total_loss"], total_ref, rtol=1e-4, atol=1e-3)

    # Ragged case: HW = 135 (not a multiple of 128) -> in-kernel lane mask on the last tile.
    k3, k4 = jax.random.split(k2)
    yh2 = jax.random.normal(k3, (2, 4, 9, 15), dtype=jnp.float32)
    y2 = jax.nn.softmax(jax.random.normal(k4, (2, 4, 9, 15)), axis=1).astype(jnp.float32)
    _check(yh2, y2)

    # Small-spatial case: HW = 80 < 128 -> single full-extent tile, no masking.
    k5, k6 = jax.random.split(k4)
    yh3 = jax.random.normal(k5, (2, 4, 8, 10), dtype=jnp.float32)
    y3 = jax.nn.softmax(jax.random.normal(k6, (2, 4, 8, 10)), axis=1).astype(jnp.float32)
    _check(yh3, y3)

    print("KERNEL_OK")
</pallas_src>

<mosaic_0001>
module attributes {stable_mosaic.version = 11 : i64} {
  func.func @kernel(%arg0: i32, %arg1: memref<2x4x128xf32, #tpu.memory_space<vmem>>, %arg2: memref<2x4x128xf32, #tpu.memory_space<vmem>>, %arg3: memref<1x2x4x128xf32, #tpu.memory_space<vmem>>, %arg4: memref<1x2x128xf32, #tpu.memory_space<vmem>>, %arg5: memref<1x2x128xf32, #tpu.memory_space<vmem>>) attributes {dimension_semantics = [#tpu.dimension_semantics<parallel>], iteration_bounds = array<i64: 2>, scalar_prefetch = 0 : i64, scratch_operands = 0 : i64, tpu.core_type = #tpu.core_type<tc>, window_params = [{transform_indices = @transform_0, window_bounds = array<i64: 2, 4, 128>}, {transform_indices = @transform_1, window_bounds = array<i64: 2, 4, 128>}, {transform_indices = @transform_2, window_bounds = array<i64: 1, 2, 4, 128>}, {transform_indices = @transform_3, window_bounds = array<i64: 1, 2, 128>}, {transform_indices = @transform_4, window_bounds = array<i64: 1, 2, 128>}]} {
    %c0 = arith.constant 0 : index
    %c0_0 = arith.constant 0 : index
    %c0_1 = arith.constant 0 : index
    %0 = vector.load %arg1[%c0, %c0_0, %c0_1] : memref<2x4x128xf32, #tpu.memory_space<vmem>>, vector<2x4x128xf32>
    %c0_2 = arith.constant 0 : index
    %c0_3 = arith.constant 0 : index
    %c0_4 = arith.constant 0 : index
    %1 = vector.load %arg2[%c0_2, %c0_3, %c0_4] : memref<2x4x128xf32, #tpu.memory_space<vmem>>, vector<2x4x128xf32>
    %2 = arith.subf %0, %1 : vector<2x4x128xf32>
    %3 = math.absf %2 : vector<2x4x128xf32>
    %cst = arith.constant dense<0xFF800000> : vector<2x128xf32>
    %4 = vector.multi_reduction <maximumf>, %0, %cst [1] : vector<2x4x128xf32> to vector<2x128xf32>
    %5 = vector.shape_cast %4 : vector<2x128xf32> to vector<2x1x128xf32>
    %6 = vector.broadcast %5 : vector<2x1x128xf32> to vector<2x4x128xf32>
    %7 = arith.subf %0, %6 : vector<2x4x128xf32>
    %8 = math.exp %7 : vector<2x4x128xf32>
    %cst_5 = arith.constant dense<0.000000e+00> : vector<2x128xf32>
    %9 = vector.multi_reduction <add>, %8, %cst_5 [1] : vector<2x4x128xf32> to vector<2x128xf32>
    %10 = math.log %9 : vector<2x128xf32>
    %cst_6 = arith.constant dense<0.000000e+00> : vector<2x128xf32>
    %11 = vector.multi_reduction <add>, %1, %cst_6 [1] : vector<2x4x128xf32> to vector<2x128xf32>
    %12 = arith.mulf %10, %11 : vector<2x128xf32>
    %13 = arith.mulf %1, %7 : vector<2x4x128xf32>
    %cst_7 = arith.constant dense<0.000000e+00> : vector<2x128xf32>
    %14 = vector.multi_reduction <add>, %13, %cst_7 [1] : vector<2x4x128xf32> to vector<2x128xf32>
    %15 = arith.subf %12, %14 : vector<2x128xf32>
    %16 = arith.mulf %0, %1 : vector<2x4x128xf32>
    %cst_8 = arith.constant dense<0.000000e+00> : vector<2x128xf32>
    %17 = vector.multi_reduction <add>, %16, %cst_8 [1] : vector<2x4x128xf32> to vector<2x128xf32>
    %18 = arith.mulf %0, %0 : vector<2x4x128xf32>
    %cst_9 = arith.constant dense<0.000000e+00> : vector<2x128xf32>
    %19 = vector.multi_reduction <add>, %18, %cst_9 [1] : vector<2x4x128xf32> to vector<2x128xf32>
    %20 = arith.mulf %1, %1 : vector<2x4x128xf32>
    %cst_10 = arith.constant dense<0.000000e+00> : vector<2x128xf32>
    %21 = vector.multi_reduction <add>, %20, %cst_10 [1] : vector<2x4x128xf32> to vector<2x128xf32>
    %cst_11 = arith.constant 1.000000e-16 : f32
    %22 = vector.broadcast %cst_11 : f32 to vector<2x128xf32>
    %23 = arith.maximumf %19, %22 : vector<2x128xf32>
    %24 = math.rsqrt %23 : vector<2x128xf32>
    %cst_12 = arith.constant 1.000000e-16 : f32
    %25 = vector.broadcast %cst_12 : f32 to vector<2x128xf32>
    %26 = arith.maximumf %21, %25 : vector<2x128xf32>
    %27 = math.rsqrt %26 : vector<2x128xf32>
    %28 = arith.mulf %24, %27 : vector<2x128xf32>
    %29 = arith.mulf %17, %28 : vector<2x128xf32>
    %cst_13 = arith.constant -0.999998986 : f32
    %cst_14 = arith.constant 0.999998986 : f32
    %30 = vector.broadcast %cst_13 : f32 to vector<2x128xf32>
    %31 = arith.maximumf %30, %29 : vector<2x128xf32>
    %32 = vector.broadcast %cst_14 : f32 to vector<2x128xf32>
    %33 = arith.minimumf %32, %31 : vector<2x128xf32>
    %34 = math.absf %33 : vector<2x128xf32>
    %cst_15 = arith.constant -0.0012624911 : f32
    %35 = vector.broadcast %cst_15 : f32 to vector<2x128xf32>
    %36 = arith.mulf %35, %34 : vector<2x128xf32>
    %cst_16 = arith.constant 6.670090e-03 : f32
    %37 = vector.broadcast %cst_16 : f32 to vector<2x128xf32>
    %38 = arith.addf %36, %37 : vector<2x128xf32>
    %39 = arith.mulf %38, %34 : vector<2x128xf32>
    %cst_17 = arith.constant -0.0170881264 : f32
    %40 = vector.broadcast %cst_17 : f32 to vector<2x128xf32>
    %41 = arith.addf %39, %40 : vector<2x128xf32>
    %42 = arith.mulf %41, %34 : vector<2x128xf32>
    %cst_18 = arith.constant 0.0308918804 : f32
    %43 = vector.broadcast %cst_18 : f32 to vector<2x128xf32>
    %44 = arith.addf %42, %43 : vector<2x128xf32>
    %45 = arith.mulf %44, %34 : vector<2x128xf32>
    %cst_19 = arith.constant -0.0501743034 : f32
    %46 = vector.broadcast %cst_19 : f32 to vector<2x128xf32>
    %47 = arith.addf %45, %46 : vector<2x128xf32>
    %48 = arith.mulf %47, %34 : vector<2x128xf32>
    %cst_20 = arith.constant 0.0889789909 : f32
    %49 = vector.broadcast %cst_20 : f32 to vector<2x128xf32>
    %50 = arith.addf %48, %49 : vector<2x128xf32>
    %51 = arith.mulf %50, %34 : vector<2x128xf32>
    %cst_21 = arith.constant -0.214598805 : f32
    %52 = vector.broadcast %cst_21 : f32 to vector<2x128xf32>
    %53 = arith.addf %51, %52 : vector<2x128xf32>
    %54 = arith.mulf %53, %34 : vector<2x128xf32>
    %cst_22 = arith.constant 1.57079625 : f32
    %55 = vector.broadcast %cst_22 : f32 to vector<2x128xf32>
    %56 = arith.addf %54, %55 : vector<2x128xf32>
    %cst_23 = arith.constant 1.000000e+00 : f32
    %57 = vector.broadcast %cst_23 : f32 to vector<2x128xf32>
    %58 = arith.subf %57, %34 : vector<2x128xf32>
    %cst_24 = arith.constant 0.000000e+00 : f32
    %59 = vector.broadcast %cst_24 : f32 to vector<2x128xf32>
    %60 = arith.maximumf %58, %59 : vector<2x128xf32>
    %61 = math.sqrt %60 : vector<2x128xf32>
    %62 = arith.mulf %56, %61 : vector<2x128xf32>
    %cst_25 = arith.constant 0.000000e+00 : f32
    %63 = vector.broadcast %cst_25 : f32 to vector<2x128xf32>
    %64 = arith.cmpf oge, %33, %63 : vector<2x128xf32>
    %cst_26 = arith.constant 3.14159274 : f32
    %65 = vector.broadcast %cst_26 : f32 to vector<2x128xf32>
    %66 = arith.subf %65, %62 : vector<2x128xf32>
    %67 = arith.select %64, %62, %66 : vector<2x128xi1>, vector<2x128xf32>
    %cst_27 = arith.constant 57.2957802 : f32
    %68 = vector.broadcast %cst_27 : f32 to vector<2x128xf32>
    %69 = arith.mulf %67, %68 : vector<2x128xf32>
    %c0_28 = arith.constant 0 : index
    %c0_29 = arith.constant 0 : index
    %c0_30 = arith.constant 0 : index
    %c0_31 = arith.constant 0 : index
    %70 = vector.load %arg3[%c0_28, %c0_29, %c0_30, %c0_31] : memref<1x2x4x128xf32, #tpu.memory_space<vmem>>, vector<1x2x4x128xf32>
    %71 = vector.shape_cast %70 : vector<1x2x4x128xf32> to vector<2x4x128xf32>
    %72 = vector.shape_cast %3 : vector<2x4x128xf32> to vector<1x2x4x128xf32>
    tpu.vector_store %arg3[%c0_28, %c0_29, %c0_30, %c0_31], %72 {strides = array<i32>} : memref<1x2x4x128xf32, #tpu.memory_space<vmem>>, vector<1x2x4x128xf32>,
    %c0_32 = arith.constant 0 : index
    %c0_33 = arith.constant 0 : index
    %c0_34 = arith.constant 0 : index
    %73 = vector.load %arg4[%c0_32, %c0_33, %c0_34] : memref<1x2x128xf32, #tpu.memory_space<vmem>>, vector<1x2x128xf32>
    %74 = vector.shape_cast %73 : vector<1x2x128xf32> to vector<2x128xf32>
    %75 = vector.shape_cast %15 : vector<2x128xf32> to vector<1x2x128xf32>
    tpu.vector_store %arg4[%c0_32, %c0_33, %c0_34], %75 {strides = array<i32>} : memref<1x2x128xf32, #tpu.memory_space<vmem>>, vector<1x2x128xf32>,
    %c0_35 = arith.constant 0 : index
    %c0_36 = arith.constant 0 : index
    %c0_37 = arith.constant 0 : index
    %76 = vector.load %arg5[%c0_35, %c0_36, %c0_37] : memref<1x2x128xf32, #tpu.memory_space<vmem>>, vector<1x2x128xf32>
    %77 = vector.shape_cast %76 : vector<1x2x128xf32> to vector<2x128xf32>
    %78 = vector.shape_cast %69 : vector<2x128xf32> to vector<1x2x128xf32>
    tpu.vector_store %arg5[%c0_35, %c0_36, %c0_37], %78 {strides = array<i32>} : memref<1x2x128xf32, #tpu.memory_space<vmem>>, vector<1x2x128xf32>,
    return
  }
  func.func @transform_0(%arg0: i32) -> (i32, i32, i32) {
    %c0_i32 = arith.constant 0 : i32
    %c0_i32_0 = arith.constant 0 : i32
    %c0_i32_1 = arith.constant 0 : i32
    return %c0_i32, %c0_i32_0, %arg0 : i32, i32, i32
  }
  func.func @transform_1(%arg0: i32) -> (i32, i32, i32) {
    %c0_i32 = arith.constant 0 : i32
    %c0_i32_0 = arith.constant 0 : i32
    %c0_i32_1 = arith.constant 0 : i32
    return %c0_i32, %c0_i32_0, %arg0 : i32, i32, i32
  }
  func.func @transform_2(%arg0: i32) -> (i32, i32, i32, i32) {
    %c0_i32 = arith.constant 0 : i32
    %c0_i32_0 = arith.constant 0 : i32
    %c0_i32_1 = arith.constant 0 : i32
    %c0_i32_2 = arith.constant 0 : i32
    return %arg0, %c0_i32, %c0_i32_0, %c0_i32_1 : i32, i32, i32, i32
  }
  func.func @transform_3(%arg0: i32) -> (i32, i32, i32) {
    %c0_i32 = arith.constant 0 : i32
    %c0_i32_0 = arith.constant 0 : i32
    %c0_i32_1 = arith.constant 0 : i32
    return %arg0, %c0_i32, %c0_i32_0 : i32, i32, i32
  }
  func.func @transform_4(%arg0: i32) -> (i32, i32, i32) {
    %c0_i32 = arith.constant 0 : i32
    %c0_i32_0 = arith.constant 0 : i32
    %c0_i32_1 = arith.constant 0 : i32
    return %arg0, %c0_i32, %c0_i32_0 : i32, i32, i32
  }
}

</mosaic_0001>

<bundles_post_ra>
// kernel: _fused_losses.1
= control target key start
LH: loop header
LB: loop body
LE: loop exit
PB: predicated region body
PF: predicated region fallthrough
CT: control target
= control target key end

     0   :  { %s849_s15 = smov 0   ;;  %s851_s16 = smov 0   ;;  %s1028_s0 = inlined_call_operand.vmem [shape: f32[2,4,256], index: 0, kind: input, shape index: {}]   ;;  %s1029_s1 = inlined_call_operand.vmem [shape: f32[2,4,256], index: 1, kind: input, shape index: {}]   ;;  %s1030_s2 = inlined_call_operand.vmem [shape: f32[2,2,4,128], index: 2, kind: output, shape index: {0}]   ;;  %s1031_s3 = inlined_call_operand.vmem [shape: f32[2,2,128], index: 3, kind: output, shape index: {1}]   ;;  %s1032_s4 = inlined_call_operand.vmem [shape: f32[2,2,128], index: 4, kind: output, shape index: {2}]  }
   0x1   :  { %s853_s17 = smov 0  }
   0x2 LB: > { %s736_s18 = sadd.s32 4294967295, %s822_s17   ;;  %s866_s19 = sadd.s32 1, %s822_s17   ;;  %s822_s17 = sphi %s853_s17, %s1042_s17   ;;  %s818_s16 = sphi %s851_s16, %s1041_s16   ;;  %s814_s15 = sphi %s849_s15, %s1040_s15  }
   0x3   : > { %s19_s20 = ssub.s32 %s822_s17, %s866_s19  ;;  %s22_s21 = sadd.s32 1, %s818_s16 }
   0x4   : > { %p20_p0 = scmp.eq.s32.totalorder %s19_s20, 0  ;;  %p29_p1 = scmp.ne.s32.totalorder %s818_s16, %s814_s15 }
   0x5   : > { %p30_p2 = scmp.eq.s32.totalorder %s822_s17, 0  ;;  %p739_p4 = scmp.ge.s32.totalorder %s822_s17, 2 }
   0x6   : > { %s875_s22 = scalar_select %p20_p0, %s818_s16, %s22_s21  }
   0x7   : > { %p877_p3 = por %p30_p2, %p29_p1  ;;  %159 = sbr.rel (%p739_p4) target bundleno = 24 (0x18), region = 16 }
   0xc   : > { %162 = sbr.rel (!%p877_p3) target bundleno = 18 (0x12), region = 20  ;;  %s164_s24 = sand.u32 (%p877_p3), 1, %s818_s16  }
   0xd   : > { %s741_s25 = sshll.u32 (%p877_p3), %s822_s17, 2  ;;  %s740_s26 = sshll.u32 (%p877_p3), %s164_s24, 3 }
   0xe   : > { %s168_s29 = scalar_lea.vmem (%p877_p3), %s1028_s0, %s741_s25  ;;  %s166_s30 = scalar_lea.vmem (%p877_p3), [#allocation2], %s740_s26 }
   0xf   : > { %v185_v0 = vld [vmem:[%s168_s29] sm:$0xf] (%p877_p3)  ;;  %v187_v1 = vld [vmem:[%s168_s29 + $0x8] sm:$0xf] (%p877_p3) }
  0x10   : > { %186 = vst [vmem:[%s166_s30] sm:$0xf] (%p877_p3), %v185_v0 }
  0x11   : > { %188 = vst [vmem:[%s166_s30 + $0x4] sm:$0xf] %v187_v1 }
  0x12 PF: > { %216 = sbr.rel (!%p877_p3) target bundleno = 24 (0x18), region = 61  ;;  %s218_s5 = sand.u32 (%p877_p3), 1, %s818_s16  }
  0x13   : > { %s743_s6 = sshll.u32 (%p877_p3), %s822_s17, 2  ;;  %s742_s7 = sshll.u32 (%p877_p3), %s218_s5, 3 }
  0x14   : > { %s222_s10 = scalar_lea.vmem (%p877_p3), %s1029_s1, %s743_s6  ;;  %s220_s11 = scalar_lea.vmem (%p877_p3), [#allocation3], %s742_s7 }
  0x15   : > { %v239_v2 = vld [vmem:[%s222_s10] sm:$0xf] (%p877_p3)  ;;  %v241_v3 = vld [vmem:[%s222_s10 + $0x8] sm:$0xf] (%p877_p3) }
  0x16   : > { %240 = vst [vmem:[%s220_s11] sm:$0xf] (%p877_p3), %v239_v2 }
  0x17   : > { %242 = vst [vmem:[%s220_s11 + $0x4] sm:$0xf] %v241_v3 }
  0x18 PF: > { %p744_p5 = scmp.ge.s32.totalorder %s822_s17, 1  ;;  %p269_p6 = scmp.lt.s32.totalorder %s822_s17, 3 }
  0x1a   : > { %p270_p7 = pnand %p744_p5, %p269_p6 }
  0x1b   : > { %s276_s12 = sand.u32 (!%p270_p7), 1, %s814_s15   ;;  %p320_p8 = scmp.lt.s32.totalorder (!%p270_p7), %s736_s18, 1 }
  0x1c   : > { %273 = sbr.rel (%p270_p7) target bundleno = 120 (0x78), region = 102  ;;  %s745_s13 = sshll.u32 (!%p270_p7), %s276_s12, 3 }
  0x1d   : > { %s278_s14 = scalar_lea.vmem (!%p270_p7), [#allocation2], %s745_s13  ;;  %s285_s20 = scalar_lea.vmem (!%p270_p7), [#allocation3], %s745_s13 }
  0x21   : > { %s1044_s18 = smov (!%p320_p8, %s736_s18), 1  ;;  %v333_v4 = vld [vmem:[%s278_s14] sm:$0xf]  ;;  %v334_v5 = vld [vmem:[%s278_s14 + $0x4] sm:$0xf]  ;;  %vm341_vm0 = vcmask 1043456  }
  0x22   : > { %v905_v6 = vld [vmem:[%s285_s20] sm:$0xf]  ;;  %v907_v7 = vld [vmem:[%s285_s20 + $0x4] sm:$0xf]  ;;  %v342_v8 = vsel %vm341_vm0, %v333_v4, -inf  ;;  %v349_v9 = vsel %vm341_vm0, %v334_v5, -inf  ;;  %v430_v10 = vmul.f32 %v333_v4, %v333_v4  ;;  %v431_v11 = vmul.f32 %v334_v5, %v334_v5 }
  0x23   : > { %s755_s15 = sshll.u32 %s1044_s18, 3  ;;  %v337_v12 = vsub.f32 %v333_v4, %v905_v6  ;;  %v338_v13 = vsub.f32 %v334_v5, %v907_v7  ;;  %v343_v14 = vrot.slane %v342_v8, 4  ;;  %v350_v15 = vrot.slane %v349_v9, 4  ;;  %s749_s24 = sshll.u32 %s1044_s18, 1 }
  0x24   : > { %s324_s23 = scalar_lea.vmem %s1030_s2, %s755_s15  ;;  %v432_v16 = vsel %vm341_vm0, %v430_v10, 0.0  ;;  %v439_v17 = vsel %vm341_vm0, %v431_v11, 0.0  ;;  %v446_v28 = vmul.f32 %v905_v6, %v905_v6  ;;  %v447_v29 = vmul.f32 %v907_v7, %v907_v7  ;;  %s328_s27 = scalar_lea.vmem %s1031_s3, %s749_s24 }
  0x25   : > { %v339_v18 = vand.u32 2147483647, %v337_v12  ;;  %v340_v19 = vand.u32 2147483647, %v338_v13  ;;  %v344_v20 = vmax.f32 %v342_v8, %v343_v14  ;;  %v351_v21 = vmax.f32 %v349_v9, %v350_v15  ;;  %s332_s30 = scalar_lea.vmem %s1032_s4, %s749_s24 }
  0x26   : > { %v433_v22 = vrot.slane %v432_v16, 4  ;;  %v440_v23 = vrot.slane %v439_v17, 4  ;;  %v448_v34 = vsel %vm341_vm0, %v446_v28, 0.0  ;;  %v455_v35 = vsel %vm341_vm0, %v447_v29, 0.0 }
  0x27   : > { %v345_v24 = vrot.slane %v344_v20, 2  ;;  %v352_v25 = vrot.slane %v351_v21, 2  ;;  %582 = vst [vmem:[%s324_s23] sm:$0xf] %v339_v18  ;;  %v414_v38 = vmul.f32 %v905_v6, %v333_v4  ;;  %v415_v39 = vmul.f32 %v907_v7, %v334_v5 }
  0x28   : > { %v434_v26 = vadd.f32 %v433_v22, %v432_v16  ;;  %v441_v27 = vadd.f32 %v440_v23, %v439_v17  ;;  %583 = vst [vmem:[%s324_s23 + $0x4] sm:$0xf] %v340_v19  ;;  %v449_v44 = vrot.slane %v448_v34, 4  ;;  %v456_v45 = vrot.slane %v455_v35, 4 }
  0x29   : > { %v346_v30 = vmax.f32 %v344_v20, %v345_v24  ;;  %v353_v31 = vmax.f32 %v351_v21, %v352_v25  ;;  %v416_v48 = vsel %vm341_vm0, %v414_v38, 0.0  ;;  %v423_v50 = vsel %vm341_vm0, %v415_v39, 0.0 }
  0x2a   : > { %v435_v32 = vrot.slane %v434_v26, 2  ;;  %v442_v33 = vrot.slane %v441_v27, 2  ;;  %v450_v54 = vadd.f32 %v449_v44, %v448_v34  ;;  %v457_v55 = vadd.f32 %v456_v45, %v455_v35 }
  0x2b   : > { %v347_v36 = vrot.slane %v346_v30, 1  ;;  %v354_v37 = vrot.slane %v353_v31, 1  ;;  %v417_v56 = vrot.slane %v416_v48, 4  ;;  %v380_v57 = vsel %vm341_vm0, %v905_v6, 0.0 }
  0x2c   : > { %v436_v40 = vadd.f32 %v435_v32, %v434_v26  ;;  %v443_v41 = vadd.f32 %v442_v33, %v441_v27  ;;  %v424_v59 = vrot.slane %v423_v50, 4  ;;  %v387_v60 = vsel %vm341_vm0, %v907_v7, 0.0 }
  0x2d   : > { %v348_v42 = vmax.f32 %v346_v30, %v347_v36  ;;  %v355_v43 = vmax.f32 %v353_v31, %v354_v37  ;;  %v451_v62 = vrot.slane %v450_v54, 2  ;;  %v458_v63 = vrot.slane %v457_v55, 2 }
  0x2e   : > { %v437_v49 = vrot.slane %v436_v40, 1  ;;  %v444_v51 = vrot.slane %v443_v41, 1  ;;  %v381_v0 = vrot.slane %v380_v57, 4  ;;  %v418_v1 = vadd.f32 %v417_v56, %v416_v48 }
  0x2f   : > { %v356_v46 = vsub.f32 %v333_v4, %v348_v42  ;;  %v357_v47 = vsub.f32 %v334_v5, %v355_v43  ;;  %v452_v4 = vadd.f32 %v451_v62, %v450_v54  ;;  %v459_v5 = vadd.f32 %v458_v63, %v457_v55 }
  0x30   : > { %v438_v58 = vadd.f32 %v437_v49, %v436_v40  ;;  %v445_v61 = vadd.f32 %v444_v51, %v443_v41  ;;  %v388_v8 = vrot.slane %v387_v60, 4  ;;  %v425_v12 = vadd.f32 %v424_v59, %v423_v50 }
  0x31   : > { %v358_v52 = vmul.f32 1.442695, %v356_v46  ;;  %v360_v53 = vmul.f32 1.442695, %v357_v47  ;;  %v396_v3 = vmul.f32 %v356_v46, %v905_v6  ;;  %v397_v11 = vmul.f32 %v357_v47, %v907_v7 }
  0x32   : > { %v933_v2 = vmax.f32 %v438_v58, 1e-16  ;;  %v936_v9 = vmax.f32 %v445_v61, 1e-16  ;;  %v453_v13 = vrot.slane %v452_v4, 1  ;;  %v460_v14 = vrot.slane %v459_v5, 1 }
  0x33   : > { %780 = vpow2.f32 %v358_v52  ;;  %v382_v17 = vadd.f32 %v381_v0, %v380_v57  ;;  %v419_v18 = vrot.slane %v418_v1, 2  ;;  %v398_v20 = vsel %vm341_vm0, %v396_v3, 0.0 }
  0x34   : > { %782 = vpow2.f32 %v360_v53  ;;  %v454_v21 = vadd.f32 %v453_v13, %v452_v4  ;;  %v389_v23 = vadd.f32 %v388_v8, %v387_v60  ;;  %v461_v24 = vadd.f32 %v460_v14, %v459_v5 }
  0x35   : > { %784 = vrsqrt.f32 %v933_v2  ;;  %v405_v25 = vsel %vm341_vm0, %v397_v11, 0.0  ;;  %v426_v26 = vrot.slane %v425_v12, 2  ;;  %v383_v30 = vrot.slane %v382_v17, 2 }
  0x36   : > { %786 = vrsqrt.f32 %v936_v9  ;;  %v945_v27 = vmax.f32 %v454_v21, 1e-16  ;;  %v399_v31 = vrot.slane %v398_v20, 4  ;;  %v949_v32 = vmax.f32 %v461_v24, 1e-16 }
  0x37   : > { %v390_v36 = vrot.slane %v389_v23, 2  ;;  %v406_v37 = vrot.slane %v405_v25, 4  ;;  %v420_v39 = vadd.f32 %v419_v18, %v418_v1  ;;  %v384_v43 = vadd.f32 %v383_v30, %v382_v17 }
  0x38   : > { %788 = vrsqrt.f32 %v945_v27  ;;  %v400_v44 = vadd.f32 %v399_v31, %v398_v20  ;;  %v427_v45 = vadd.f32 %v426_v26, %v425_v12  ;;  %vm470_vm1 = vweird.f32 %v933_v2 }
  0x39   : > { %v781_v10 = vpop.eup %780  ;;  %790 = vrsqrt.f32 %v949_v32  ;;  %v391_v50 = vadd.f32 %v390_v36, %v389_v23  ;;  %v407_v51 = vadd.f32 %v406_v37, %v405_v25  ;;  %v421_v53 = vrot.slane %v420_v39, 1 }
  0x3a   : > { %v783_v15 = vpop.eup %782  ;;  %v362_v16 = vsel %vm341_vm0, %v781_v10, 0.0  ;;  %v385_v57 = vrot.slane %v384_v43, 1  ;;  %v401_v58 = vrot.slane %v400_v44, 2  ;;  %v428_v59 = vrot.slane %v427_v45, 1 }
  0x3b   : > { %v363_v19 = vrot.slane %v362_v16, 4  ;;  %v369_v6 = vsel %vm341_vm0, %v783_v15, 0.0  ;;  %v947_v28 = vpop.eup %784  ;;  %v392_v0 = vrot.slane %v391_v50, 1  ;;  %v408_v1 = vrot.slane %v407_v51, 2 }
  0x3c   : > { %v370_v22 = vrot.slane %v369_v6, 4  ;;  %v465_v34 = vmul.f32 %v947_v28, %v933_v2  ;;  %v956_v41 = vpop.eup %786  ;;  %vm471_vm2 = vweird.f32 %v947_v28  ;;  %v402_v8 = vadd.f32 %v401_v58, %v400_v44 }
  0x3d   : > { %v364_v7 = vadd.f32 %v363_v19, %v362_v16  ;;  %v475_v48 = vmul.f32 %v956_v41, %v936_v9  ;;  %vm480_vm3 = vweird.f32 %v936_v9  ;;  %vm481_vm4 = vweird.f32 %v956_v41  ;;  %vm969_vm7 = vmor %vm470_vm1, %vm471_vm2 }
  0x3e   : > { %v371_v29 = vadd.f32 %v370_v22, %v369_v6  ;;  %v466_v40 = vmul.f32 %v947_v28, %v465_v34  ;;  %v789_v55 = vpop.eup %788  ;;  %vm492_vm5 = vweird.f32 %v945_v27  ;;  %vm502_vm8 = vweird.f32 %v949_v32  ;;  %vm975_vm10 = vmor %vm480_vm3, %vm481_vm4 }
  0x3f   : > { %v365_v33 = vrot.slane %v364_v7, 2  ;;  %v476_v54 = vmul.f32 %v956_v41, %v475_v48  ;;  %v791_v60 = vpop.eup %790  ;;  %v487_v63 = vmul.f32 %v789_v55, %v945_v27  ;;  %vm493_vm6 = vweird.f32 %v789_v55 }
  0x40   : > { %v372_v35 = vrot.slane %v371_v29, 2  ;;  %v467_v47 = vmul.f32 0.5, %v466_v40  ;;  %v497_v3 = vmul.f32 %v791_v60, %v949_v32  ;;  %vm503_vm9 = vweird.f32 %v791_v60  ;;  %vm979_vm11 = vmor %vm492_vm5, %vm493_vm6 }
  0x41   : > { %v366_v38 = vadd.f32 %v365_v33, %v364_v7  ;;  %v477_v62 = vmul.f32 0.5, %v476_v54  ;;  %v488_v5 = vmul.f32 %v789_v55, %v487_v63  ;;  %v409_v15 = vadd.f32 %v408_v1, %v407_v51  ;;  %vm504_vm12 = vmor %vm502_vm8, %vm503_vm9 }
  0x42   : > { %v373_v42 = vadd.f32 %v372_v35, %v371_v29  ;;  %v468_v61 = vsub.f32 1.5, %v467_v47  ;;  %v498_v10 = vmul.f32 %v791_v60, %v497_v3  ;;  %v422_v19 = vadd.f32 %v421_v53, %v420_v39 }
  0x43   : > { %v367_v46 = vrot.slane %v366_v38, 1  ;;  %v478_v4 = vsub.f32 1.5, %v477_v62  ;;  %v489_v12 = vmul.f32 0.5, %v488_v5  ;;  %v386_v21 = vadd.f32 %v385_v57, %v384_v43 }
  0x44   : > { %v374_v49 = vrot.slane %v373_v42, 1  ;;  %v469_v11 = vmul.f32 %v947_v28, %v468_v61  ;;  %v499_v14 = vmul.f32 0.5, %v498_v10  ;;  %v429_v22 = vadd.f32 %v428_v59, %v427_v45 }
  0x45   : > { %v368_v52 = vadd.f32 %v367_v46, %v366_v38  ;;  %v479_v2 = vmul.f32 %v956_v41, %v478_v4  ;;  %v490_v17 = vsub.f32 1.5, %v489_v12  ;;  %v393_v7 = vadd.f32 %v392_v0, %v391_v50 }
  0x46   : > { %v375_v56 = vadd.f32 %v374_v49, %v373_v42  ;;  %v500_v20 = vsub.f32 1.5, %v499_v14  ;;  %v473_v23 = vsel %vm969_vm7, %v947_v28, %v469_v11  ;;  %v403_v25 = vrot.slane %v402_v8, 1 }
  0x47   : > { %792 = vlog2.f32 %v368_v52  ;;  %v491_v24 = vmul.f32 %v789_v55, %v490_v17  ;;  %v483_v26 = vsel %vm975_vm10, %v956_v41, %v479_v2  ;;  %v410_v31 = vrot.slane %v409_v15, 1 }
  0x48   : > { %794 = vlog2.f32 %v375_v56  ;;  %v501_v27 = vmul.f32 %v791_v60, %v500_v20  ;;  %v404_v28 = vadd.f32 %v403_v25, %v402_v8  ;;  %vm586_vm13 = vcmask 1041409  }
  0x49   : > { %v495_v32 = vsel %vm979_vm11, %v789_v55, %v491_v24  ;;  %v411_v39 = vadd.f32 %v410_v31, %v409_v15 }
  0x4a   : > { %v505_v33 = vsel %vm504_vm12, %v791_v60, %v501_v27  ;;  %v506_v34 = vmul.f32 %v495_v32, %v473_v23 }
  0x4b   : > { %v507_v35 = vmul.f32 %v505_v33, %v483_v26 }
  0x4c   : > { %v991_v36 = vmul.f32 %v506_v34, %v422_v19 }
  0x4d   : > { %v793_v9 = vpop.eup %792  ;;  %v993_v40 = vmul.f32 %v507_v35, %v429_v22 }
  0x4e   : > { %v795_v18 = vpop.eup %794  ;;  %v377_v29 = vmul.f32 0.6931472, %v793_v9  ;;  %v751_v41 = vclamps-f32 %v991_v36, 0.999999 }
  0x4f   : > { %v379_v30 = vmul.f32 0.6931472, %v795_v18  ;;  %v752_v42 = vclamps-f32 %v993_v40, 0.999999 }
  0x50   : > { %v394_v37 = vmul.f32 %v386_v21, %v377_v29  ;;  %v514_v43 = vand.u32 2147483647, %v751_v41  ;;  %vm574_vm2 = vcmp.ge.f32.partialorder %v751_v41, 0.0 }
  0x51   : > { %v395_v38 = vmul.f32 %v393_v7, %v379_v30  ;;  %v515_v46 = vand.u32 2147483647, %v752_v42  ;;  %vm575_vm3 = vcmp.ge.f32.partialorder %v752_v42, 0.0 }
  0x52   : > { %v412_v44 = vsub.f32 %v394_v37, %v404_v28  ;;  %v516_v47 = vmul.f32 -0.0012624911, %v514_v43  ;;  %v544_v48 = vsub.f32 1.0, %v514_v43 }
  0x53   : > { %v413_v45 = vsub.f32 %v395_v38, %v411_v39  ;;  %v517_v49 = vmul.f32 -0.0012624911, %v515_v46  ;;  %v545_v50 = vsub.f32 1.0, %v515_v46 }
  0x54   : > { %v518_v51 = vadd.f32 0.00667009, %v516_v47  ;;  %v546_v52 = vmax.f32 %v544_v48, 0.0 }
  0x55   : > { %v519_v53 = vadd.f32 0.00667009, %v517_v49  ;;  %v547_v54 = vmax.f32 %v545_v50, 0.0  ;;  %v587_v55 = vsel %vm586_vm13, %v413_v45, %v412_v44 }
  0x56   : > { %v520_v56 = vmul.f32 %v518_v51, %v514_v43  ;;  %796 = vrsqrt.f32 %v546_v52  ;;  %589 = vst [vmem:[%s328_s27] sm:$0x3] %v587_v55  ;;  %vm555_vm14 = vcmp.eq.f32.partialorder %v546_v52, inf  ;;  %v558_v24 = vand.u32 2147483648, %v546_v52 }
  0x57   : > { %v521_v57 = vmul.f32 %v519_v53, %v515_v46  ;;  %798 = vrsqrt.f32 %v547_v54  ;;  %vm567_vm15 = vcmp.eq.f32.partialorder %v547_v54, inf  ;;  %vm557_vm0 = vcmp.eq.f32.partialorder %v546_v52, 0.0 }
  0x58   : > { %v522_v58 = vadd.f32 -0.017088126, %v520_v56  ;;  %v570_v26 = vand.u32 2147483648, %v547_v54  ;;  %vm569_vm1 = vcmp.eq.f32.partialorder %v547_v54, 0.0 }
  0x59   : > { %v523_v59 = vadd.f32 -0.017088126, %v521_v57 }
  0x5a   : > { %v524_v60 = vmul.f32 %v522_v58, %v514_v43 }
  0x5b   : > { %v525_v61 = vmul.f32 %v523_v59, %v515_v46 }
  0x5c   : > { %v797_v62 = vpop.eup %796  ;;  %v526_v63 = vadd.f32 0.03089188, %v524_v60 }
  0x5d   : > { %v799_v0 = vpop.eup %798  ;;  %v527_v1 = vadd.f32 0.03089188, %v525_v61  ;;  %v549_v3 = vmul.f32 %v797_v62, %v546_v52 }
  0x5e   : > { %v528_v4 = vmul.f32 %v526_v63, %v514_v43  ;;  %v561_v5 = vmul.f32 %v799_v0, %v547_v54 }
  0x5f   : > { %v529_v8 = vmul.f32 %v527_v1, %v515_v46  ;;  %v550_v10 = vmul.f32 %v797_v62, %v549_v3 }
  0x60   : > { %v530_v11 = vadd.f32 -0.050174303, %v528_v4  ;;  %v562_v12 = vmul.f32 %v799_v0, %v561_v5 }
  0x61   : > { %v531_v13 = vadd.f32 -0.050174303, %v529_v8  ;;  %v551_v2 = vmul.f32 0.5, %v550_v10 }
  0x62   : > { %v532_v14 = vmul.f32 %v530_v11, %v514_v43  ;;  %v563_v9 = vmul.f32 0.5, %v562_v12 }
  0x63   : > { %v533_v15 = vmul.f32 %v531_v13, %v515_v46  ;;  %v552_v16 = vsub.f32 1.5, %v551_v2 }
  0x64   : > { %v534_v17 = vadd.f32 0.08897899, %v532_v14  ;;  %v564_v18 = vsub.f32 1.5, %v563_v9 }
  0x65   : > { %v535_v19 = vadd.f32 0.08897899, %v533_v15  ;;  %v553_v6 = vmul.f32 %v797_v62, %v552_v16 }
  0x66   : > { %v536_v20 = vmul.f32 %v534_v17, %v514_v43  ;;  %v565_v21 = vmul.f32 %v799_v0, %v564_v18 }
  0x67   : > { %v537_v22 = vmul.f32 %v535_v19, %v515_v46  ;;  %v554_v23 = vmul.f32 %v553_v6, %v546_v52 }
  0x68   : > { %v538_v7 = vadd.f32 -0.2145988, %v536_v20  ;;  %v566_v25 = vmul.f32 %v565_v21, %v547_v54 }
  0x69   : > { %v539_v27 = vadd.f32 -0.2145988, %v537_v22  ;;  %v556_v29 = vsel %vm555_vm14, %v546_v52, %v554_v23 }
  0x6a   : > { %v540_v30 = vmul.f32 %v538_v7, %v514_v43  ;;  %v568_v31 = vsel %vm567_vm15, %v547_v54, %v566_v25  ;;  %v559_v33 = vsel %vm557_vm0, %v558_v24, %v556_v29 }
  0x6b   : > { %v541_v32 = vmul.f32 %v539_v27, %v515_v46  ;;  %v571_v35 = vsel %vm569_vm1, %v570_v26, %v568_v31 }
  0x6c   : > { %v542_v34 = vadd.f32 1.5707963, %v540_v30 }
  0x6d   : > { %v543_v28 = vadd.f32 1.5707963, %v541_v32 }
  0x6e   : > { %v572_v37 = vmul.f32 %v559_v33, %v542_v34 }
  0x6f   : > { %v573_v38 = vmul.f32 %v571_v35, %v543_v28 }
  0x70   : > { %v576_v39 = vsub.f32 3.1415927, %v572_v37 }
  0x71   : > { %v577_v44 = vsub.f32 3.1415927, %v573_v38 }
  0x72   : > { %v578_v45 = vsel %vm574_vm2, %v572_v37, %v576_v39 }
  0x73   : > { %v579_v47 = vsel %vm575_vm3, %v573_v38, %v577_v44  ;;  %v580_v43 = vmul.f32 57.29578, %v578_v45 }
  0x74   : > { %v581_v46 = vmul.f32 57.29578, %v579_v47 }
  0x76   : > { %v592_v48 = vsel %vm586_vm13, %v581_v46, %v580_v43 }
  0x77   : > { %594 = vst [vmem:[%s332_s30] sm:$0x3] %v592_v48 }
  0x78 PF: > { %p12_p9 = scmp.ge.s32.totalorder %s866_s19, 4   ;;  %s1040_s15 = smov %s818_s16 }
  0x79   : > { %s1041_s16 = smov %s875_s22  ;;  %s1042_s17 = smov %s866_s19 }
  0x7a   :  { %14 = sbr.rel (!%p12_p9) target bundleno = 2 (0x2), region = 177 }

</bundles_post_ra>
